<compile_context>
chip_gen: v6e
topology: v6e:2x2x1
jax: 0.10.0
libtpu: 0.0.40
codegen_flags: <defaults>
</compile_context>

<pallas_src>
import functools
import math

import jax
import jax.numpy as jnp
from jax.experimental import pallas as pl
from jax.experimental.pallas import tpu as pltpu


def _round_up(x, m):
    return ((x + m - 1) // m) * m


def _time_embedding_kernel(t_ref, freqs_ref, w1_ref, b1_ref, w2_ref, b2_ref,
                           o_ref, *, bf16_silu):
    # t_ref:     [TN, 1]  f32  timesteps for this tile
    # freqs_ref: [1, H]   f32  sinusoid frequencies (H = F // 2)
    # w1_ref:    [F, D]   bf16 Linear(F->D) weight, [in, out] layout
    # b1_ref:    [1, D]   f32
    # w2_ref:    [D, F]   bf16 Linear(D->F) weight, [in, out] layout
    # b2_ref:    [1, F]   f32
    # o_ref:     [TN, F]
    args = t_ref[...] * freqs_ref[...]          # [TN, H] outer product, in VMEM
    cos_e = jnp.cos(args)                       # transcendentals in f32
    sin_e = jnp.sin(args)

    # embedding = [cos | sin] exactly like torch.cat([cos, sin], dim=-1);
    # lane concat (H == 128) then one K=F MXU pass, f32 accumulation.
    emb = jnp.concatenate([cos_e, sin_e], axis=-1).astype(jnp.bfloat16)
    h = jnp.dot(emb, w1_ref[...], preferred_element_type=jnp.float32)
    h = h + b1_ref[...]                         # bias add in f32

    if bf16_silu:                               # v6e / v7x: bf16 VPU + EUP
        hb = h.astype(jnp.bfloat16)
        hb = hb * jax.nn.sigmoid(hb)
    else:                                       # v5e and older: f32 SiLU
        h = h * jax.nn.sigmoid(h)
        hb = h.astype(jnp.bfloat16)

    out = jnp.dot(hb, w2_ref[...], preferred_element_type=jnp.float32)
    out = out + b2_ref[...]
    o_ref[...] = out.astype(o_ref.dtype)


def _use_bf16_silu():
    """bf16 VPU/EUP exists on v6e and newer; keep SiLU in f32 on older gens."""
    try:
        kind = jax.devices()[0].device_kind.lower()
    except Exception:
        return False
    return not any(tag in kind for tag in ("v2", "v3", "v4", "v5"))


def _pick_tile_n(n):
    if n < 64:
        # launch/overhead bound: one small tile (padded to 8 sublanes)
        return max(8, _round_up(n, 8))
    # >= 2 grid steps so both v7x TensorCores get work; cap at 1024 rows/tile
    # (amortizes ~0.35us/step, per-tile working set is still only a few MB).
    return min(1024, _round_up((n + 1) // 2, 8))


def time_embedding_forward(t, params, frequency_embedding_size=256,
                           max_period=10000, out_dtype=jnp.float32,
                           bf16_silu=None):
    """t: [N] (or scalar) timesteps -> [N, frequency_embedding_size]."""
    t = jnp.asarray(t)
    if t.ndim == 0:
        t = t[None]
    n = t.shape[0]
    fdim = frequency_embedding_size
    half = fdim // 2
    # TODO(synk): odd frequency_embedding_size would need the zero-pad column
    # from the PyTorch reference (dim % 2 == 1); the default (even) 256 is fine.

    if bf16_silu is None:
        bf16_silu = _use_bf16_silu()

    w1, b1, w2, b2 = params["w1"], params["b1"], params["w2"], params["b2"]
    hidden = w1.shape[1]
    # Zero-pad hidden to a lane multiple (exactly preserves the result: padded
    # w1 cols / b1 entries are 0 -> SiLU(0)=0, padded w2 rows are 0).
    hidden_p = max(128, _round_up(hidden, 128))
    if hidden_p != hidden:
        w1 = jnp.pad(w1, ((0, 0), (0, hidden_p - hidden)))
        b1 = jnp.pad(b1, ((0, 0), (0, hidden_p - hidden)))
        w2 = jnp.pad(w2, ((0, hidden_p - hidden), (0, 0)))

    tile_n = _pick_tile_n(n)
    n_pad = _round_up(n, tile_n)

    t32 = t.astype(jnp.float32).reshape(n, 1)
    if n_pad != n:
        t32 = jnp.pad(t32, ((0, n_pad - n), (0, 0)))

    # freqs is a compile-time constant row vector; the [TN,1]x[1,H] outer
    # product happens in-kernel so no [N, H] args array hits HBM.
    freqs = jnp.exp(
        -math.log(max_period)
        * jnp.arange(half, dtype=jnp.float32) / half).reshape(1, half)

    flops = 4 * n_pad * fdim * hidden_p                 # two F*D matmuls
    transcendentals = n_pad * (fdim + hidden_p)         # cos + sin + sigmoid
    bytes_accessed = (n_pad * 4 + half * 4
                      + w1.size * w1.dtype.itemsize
                      + w2.size * w2.dtype.itemsize
                      + b1.size * 4 + b2.size * 4
                      + n_pad * fdim * jnp.dtype(out_dtype).itemsize)

    kernel = functools.partial(_time_embedding_kernel, bf16_silu=bf16_silu)
    out = pl.pallas_call(
        kernel,
        out_shape=jax.ShapeDtypeStruct((n_pad, fdim), out_dtype),
        grid_spec=pl.GridSpec(
            grid=(n_pad // tile_n,),
            in_specs=[
                pl.BlockSpec((tile_n, 1), lambda i: (i, 0)),        # t
                # constants / weights: constant index_map -> resident in VMEM
                pl.BlockSpec((1, half), lambda i: (0, 0)),           # freqs
                pl.BlockSpec((fdim, hidden_p), lambda i: (0, 0)),    # w1
                pl.BlockSpec((1, hidden_p), lambda i: (0, 0)),       # b1
                pl.BlockSpec((hidden_p, fdim), lambda i: (0, 0)),    # w2
                pl.BlockSpec((1, fdim), lambda i: (0, 0)),           # b2
            ],
            out_specs=pl.BlockSpec((tile_n, fdim), lambda i: (i, 0)),
        ),
        compiler_params=pltpu.CompilerParams(
            dimension_semantics=("parallel",)),
        cost_estimate=pl.CostEstimate(
            flops=flops,
            transcendentals=transcendentals,
            bytes_accessed=bytes_accessed),
    )(t32, freqs, w1, b1, w2, b2)
    return out[:n]


def init_params(key, hidden_size, frequency_embedding_size=256):
    """Synthetic params matching nn.Linear shapes (stored [in, out]); bf16 weights."""
    k1, k2, k3, k4 = jax.random.split(key, 4)
    f = frequency_embedding_size
    d = hidden_size
    lim1 = 1.0 / math.sqrt(f)
    lim2 = 1.0 / math.sqrt(d)
    return {
        "w1": jax.random.uniform(k1, (f, d), jnp.float32, -lim1, lim1
                                 ).astype(jnp.bfloat16),
        "b1": jax.random.uniform(k2, (1, d), jnp.float32, -lim1, lim1),
        "w2": jax.random.uniform(k3, (d, f), jnp.float32, -lim2, lim2
                                 ).astype(jnp.bfloat16),
        "b2": jax.random.uniform(k4, (1, f), jnp.float32, -lim2, lim2),
    }


def _reference_forward(t, params, fdim=256, max_period=10000, bf16_silu=False):
    """Pure-JAX reference mirroring the kernel's precision policy
    (bf16 MXU inputs, f32 accumulation, SiLU in bf16 iff the kernel does)."""
    t = jnp.asarray(t)
    if t.ndim == 0:
        t = t[None]
    half = fdim // 2
    freqs = jnp.exp(-math.log(max_period)
                    * jnp.arange(half, dtype=jnp.float32) / half)
    args = t.astype(jnp.float32)[:, None] * freqs[None, :]
    emb = jnp.concatenate([jnp.cos(args), jnp.sin(args)], axis=-1)
    h = jnp.dot(emb.astype(jnp.bfloat16), params["w1"],
                preferred_element_type=jnp.float32) + params["b1"]
    if bf16_silu:
        hb = h.astype(jnp.bfloat16)
        hb = hb * jax.nn.sigmoid(hb)
    else:
        hb = (h * jax.nn.sigmoid(h)).astype(jnp.bfloat16)
    out = jnp.dot(hb, params["w2"],
                  preferred_element_type=jnp.float32) + params["b2"]
    return out


if __name__ == "__main__":
    key = jax.random.PRNGKey(0)
    kp, kt = jax.random.split(key)

    hidden_size = 32
    freq_size = 256
    batch = 8

    params = init_params(kp, hidden_size, freq_size)
    # timesteps: small positive values, one per batch element
    t = jax.random.uniform(kt, (batch,), jnp.float32, 0.0, 1000.0)

    bf16_silu = _use_bf16_silu()
    out = time_embedding_forward(t, params, freq_size, bf16_silu=bf16_silu)
    out = jax.block_until_ready(out)

    ref = _reference_forward(t, params, freq_size, bf16_silu=bf16_silu)
    assert out.shape == (batch, freq_size), out.shape
    max_err = float(jnp.max(jnp.abs(out - ref)))
    assert jnp.allclose(out, ref, atol=5e-3, rtol=5e-3), max_err

    print("KERNEL_OK")
</pallas_src>

<mosaic_0001>
module attributes {stable_mosaic.version = 11 : i64} {
  func.func @_time_embedding_kernel(%arg0: i32, %arg1: memref<8x1xf32, #tpu.memory_space<vmem>>, %arg2: memref<1x128xf32, #tpu.memory_space<vmem>>, %arg3: memref<256x128xbf16, #tpu.memory_space<vmem>>, %arg4: memref<1x128xf32, #tpu.memory_space<vmem>>, %arg5: memref<128x256xbf16, #tpu.memory_space<vmem>>, %arg6: memref<1x256xf32, #tpu.memory_space<vmem>>, %arg7: memref<8x256xf32, #tpu.memory_space<vmem>>) attributes {dimension_semantics = [#tpu.dimension_semantics<parallel>], iteration_bounds = array<i64: 1>, scalar_prefetch = 0 : i64, scratch_operands = 0 : i64, tpu.core_type = #tpu.core_type<tc>, window_params = [{transform_indices = @transform_0, window_bounds = array<i64: 8, 1>}, {pipeline_mode = #tpu.pipeline_mode<synchronous>, transform_indices = @transform_1, window_bounds = array<i64: 1, 128>}, {pipeline_mode = #tpu.pipeline_mode<synchronous>, transform_indices = @transform_2, window_bounds = array<i64: 256, 128>}, {pipeline_mode = #tpu.pipeline_mode<synchronous>, transform_indices = @transform_3, window_bounds = array<i64: 1, 128>}, {pipeline_mode = #tpu.pipeline_mode<synchronous>, transform_indices = @transform_4, window_bounds = array<i64: 128, 256>}, {pipeline_mode = #tpu.pipeline_mode<synchronous>, transform_indices = @transform_5, window_bounds = array<i64: 1, 256>}, {transform_indices = @transform_6, window_bounds = array<i64: 8, 256>}]} {
    %c0 = arith.constant 0 : index
    %c0_0 = arith.constant 0 : index
    %0 = vector.load %arg1[%c0, %c0_0] : memref<8x1xf32, #tpu.memory_space<vmem>>, vector<8x1xf32>
    %c0_1 = arith.constant 0 : index
    %c0_2 = arith.constant 0 : index
    %1 = vector.load %arg2[%c0_1, %c0_2] : memref<1x128xf32, #tpu.memory_space<vmem>>, vector<1x128xf32>
    %2 = vector.broadcast %0 : vector<8x1xf32> to vector<8x128xf32>
    %3 = vector.broadcast %1 : vector<1x128xf32> to vector<8x128xf32>
    %4 = arith.mulf %2, %3 : vector<8x128xf32>
    %5 = math.cos %4 : vector<8x128xf32>
    %6 = math.sin %4 : vector<8x128xf32>
    %7 = tpu.concatenate %5, %6 in 1 : vector<8x128xf32>, vector<8x128xf32> -> vector<8x256xf32>
    %8 = arith.truncf %7 : vector<8x256xf32> to vector<8x256xbf16>
    %c0_3 = arith.constant 0 : index
    %c0_4 = arith.constant 0 : index
    %9 = vector.load %arg3[%c0_3, %c0_4] : memref<256x128xbf16, #tpu.memory_space<vmem>>, vector<256x128xbf16>
    %cst = arith.constant dense<0.000000e+00> : vector<8x128xf32>
    %10 = tpu.matmul %8, %9, %cst {dimension_numbers = #tpu.dot_dimension_numbers<[1], [0], [0], [1], [0, 0, 1, 1], [], []>} : vector<8x256xbf16>, vector<256x128xbf16>, vector<8x128xf32> -> vector<8x128xf32>
    %c0_5 = arith.constant 0 : index
    %c0_6 = arith.constant 0 : index
    %11 = vector.load %arg4[%c0_5, %c0_6] : memref<1x128xf32, #tpu.memory_space<vmem>>, vector<1x128xf32>
    %12 = vector.broadcast %11 : vector<1x128xf32> to vector<8x128xf32>
    %13 = arith.addf %10, %12 : vector<8x128xf32>
    %14 = arith.truncf %13 : vector<8x128xf32> to vector<8x128xbf16>
    %15 = arith.negf %14 : vector<8x128xbf16>
    %16 = math.exp %15 : vector<8x128xbf16>
    %cst_7 = arith.constant 1.000000e+00 : bf16
    %17 = vector.broadcast %cst_7 : bf16 to vector<8x128xbf16>
    %18 = arith.addf %17, %16 : vector<8x128xbf16>
    %19 = arith.divf %17, %18 : vector<8x128xbf16>
    %20 = arith.mulf %14, %19 : vector<8x128xbf16>
    %c0_8 = arith.constant 0 : index
    %c0_9 = arith.constant 0 : index
    %21 = vector.load %arg5[%c0_8, %c0_9] : memref<128x256xbf16, #tpu.memory_space<vmem>>, vector<128x256xbf16>
    %cst_10 = arith.constant dense<0.000000e+00> : vector<8x256xf32>
    %22 = tpu.matmul %20, %21, %cst_10 {dimension_numbers = #tpu.dot_dimension_numbers<[1], [0], [0], [1], [0, 0, 1, 1], [], []>} : vector<8x128xbf16>, vector<128x256xbf16>, vector<8x256xf32> -> vector<8x256xf32>
    %c0_11 = arith.constant 0 : index
    %c0_12 = arith.constant 0 : index
    %23 = vector.load %arg6[%c0_11, %c0_12] : memref<1x256xf32, #tpu.memory_space<vmem>>, vector<1x256xf32>
    %24 = vector.broadcast %23 : vector<1x256xf32> to vector<8x256xf32>
    %25 = arith.addf %22, %24 : vector<8x256xf32>
    %c0_13 = arith.constant 0 : index
    %c0_14 = arith.constant 0 : index
    %26 = vector.load %arg7[%c0_13, %c0_14] : memref<8x256xf32, #tpu.memory_space<vmem>>, vector<8x256xf32>
    tpu.vector_store %arg7[%c0_13, %c0_14], %25 {strides = array<i32>} : memref<8x256xf32, #tpu.memory_space<vmem>>, vector<8x256xf32>,
    return
  }
  func.func @transform_0(%arg0: i32) -> (i32, i32) {
    %c0_i32 = arith.constant 0 : i32
    %c0_i32_0 = arith.constant 0 : i32
    return %arg0, %c0_i32 : i32, i32
  }
  func.func @transform_1(%arg0: i32) -> (i32, i32) {
    %c0_i32 = arith.constant 0 : i32
    %c0_i32_0 = arith.constant 0 : i32
    %c0_i32_1 = arith.constant 0 : i32
    return %c0_i32, %c0_i32_0 : i32, i32
  }
  func.func @transform_2(%arg0: i32) -> (i32, i32) {
    %c0_i32 = arith.constant 0 : i32
    %c0_i32_0 = arith.constant 0 : i32
    %c0_i32_1 = arith.constant 0 : i32
    return %c0_i32, %c0_i32_0 : i32, i32
  }
  func.func @transform_3(%arg0: i32) -> (i32, i32) {
    %c0_i32 = arith.constant 0 : i32
    %c0_i32_0 = arith.constant 0 : i32
    %c0_i32_1 = arith.constant 0 : i32
    return %c0_i32, %c0_i32_0 : i32, i32
  }
  func.func @transform_4(%arg0: i32) -> (i32, i32) {
    %c0_i32 = arith.constant 0 : i32
    %c0_i32_0 = arith.constant 0 : i32
    %c0_i32_1 = arith.constant 0 : i32
    return %c0_i32, %c0_i32_0 : i32, i32
  }
  func.func @transform_5(%arg0: i32) -> (i32, i32) {
    %c0_i32 = arith.constant 0 : i32
    %c0_i32_0 = arith.constant 0 : i32
    %c0_i32_1 = arith.constant 0 : i32
    return %c0_i32, %c0_i32_0 : i32, i32
  }
  func.func @transform_6(%arg0: i32) -> (i32, i32) {
    %c0_i32 = arith.constant 0 : i32
    %c0_i32_0 = arith.constant 0 : i32
    return %arg0, %c0_i32 : i32, i32
  }
}

</mosaic_0001>

<bundles_post_ra>
// kernel: tpu_custom_call.1
= control target key start
LH: loop header
LB: loop body
LE: loop exit
PB: predicated region body
PF: predicated region fallthrough
CT: control target
= control target key end

     0   :  { %11 = vsyncpa [#allocation3], 0  ;;  %s917_s0 = inlined_call_operand.vmem [shape: f32[8,1], index: 0, kind: input, shape index: {}]   ;;  %s918_s1 = inlined_call_operand.vmem [shape: f32[1,128], index: 1, kind: input, shape index: {}]   ;;  %s919_s2 = inlined_call_operand.hbm [shape: bf16[256,128], index: 2, kind: input, shape index: {}]   ;;  %s920_s3 = inlined_call_operand.vmem [shape: f32[1,128], index: 3, kind: input, shape index: {}]   ;;  %s921_s4 = inlined_call_operand.hbm [shape: bf16[128,256], index: 4, kind: input, shape index: {}]   ;;  %s922_s5 = inlined_call_operand.vmem [shape: f32[1,256], index: 5, kind: input, shape index: {}]   ;;  %s923_s6 = inlined_call_operand.hbm [shape: f32[8,256], index: 6, kind: output, shape index: {}]  }
   0x1   :  { %12 = vsyncpa [#allocation6], 0 }
   0x2   :  { %13 = vsyncpa [#allocation4], 0  ;;  %s826_s21 = smov [#allocation2]  }
   0x3   :  { %s23_s22 = sshll.u32 %s826_s21, 4  ;;  %s24_s22 = int_to_ptr.vmem [resolvable:$true] %s23_s22 }
   0x4   :  { %s768_s23 = scalar_lea.vmem %s24_s22, 2048  ;;  %p773_p1 = scmp.lt.s32.totalorder %s24_s22, %s24_s22 }
   0x5   :  { %p769_p0 = scmp.ne.s32.totalorder %s24_s22, %s768_s23  ;;  %p774_p2 = scmp.lt.s32.totalorder %s768_s23, %s768_s23 }
   0x7   :  { %p775_p3 = por %p774_p2, %p773_p1 }
   0x9   :  { %p776_p4 = pnand %p775_p3, %p769_p0 }
   0xb   :  { %779 = shalt.err (!%p776_p4)
}
   0xc   :  { %s827_s24 = smov 64   ;;  %s828_s25 = smov 4  }
   0xd   :  { %29 = dma.hbm_to_vmem [thread:$0]  %s919_s2, 2048, %s24_s22, [#allocation3], %s827_s24, %s827_s24, %s828_s25  }
   0xe   :  { %s829_s28 = smov [#allocation5]  }
   0xf   :  { %s37_s29 = sshll.u32 %s829_s28, 4  ;;  %s38_s29 = int_to_ptr.vmem [resolvable:$true] %s37_s29 }
  0x10   :  { %s788_s30 = scalar_lea.vmem %s38_s29, 2048  ;;  %p793_p6 = scmp.lt.s32.totalorder %s38_s29, %s38_s29 }
  0x11   :  { %p789_p5 = scmp.ne.s32.totalorder %s38_s29, %s788_s30  ;;  %p794_p7 = scmp.lt.s32.totalorder %s788_s30, %s788_s30 }
  0x13   :  { %p795_p8 = por %p794_p7, %p793_p6 }
  0x15   :  { %p796_p9 = pnand %p795_p8, %p789_p5 }
  0x17   :  { %799 = shalt.err (!%p796_p9)
}
  0x18   :  { %s830_s7 = smov 128   ;;  %s831_s8 = smov 8  }
  0x19   :  { %43 = dma.hbm_to_vmem [thread:$0]  %s921_s4, 2048, %s38_s29, [#allocation6], %s830_s7, %s830_s7, %s831_s8  }
  0x1a   :  { %820 = dma.done.wait [#allocation3], 2048  }
  0x1b   :  { %821 = vsyncadd [#allocation3], 4294965248 }
  0x1c   :  { %822 = dma.done.wait [#allocation6], 2048  }
  0x1d   :  { %823 = vsyncadd [#allocation6], 4294965248  ;;  %v832_v0 = vmov 0   ;;  %v54_v1 = vld [vmem:[%s917_s0] sm:$0xff]  ;;  %v712_v2 = vld [vmem:[#allocation2 + $0x78] sm:$0xff]   ;;  %s839_s14 = smov [#allocation7]  }
  0x1e   :  { %711 = vset.pattern.permute.xlu0 %v832_v0  ;;  %601 = vmatprep.mubr.bf16.mxu1 %v832_v0  ;;  %v713_v3 = vld [vmem:[#allocation2 + $0x38] sm:$0xff]   ;;  %v714_v4 = vld [vmem:[#allocation2 + $0x70] sm:$0xff]   ;;  %v716_v6 = vld [vmem:[#allocation2 + $0x68] sm:$0xff]   ;;  %v833_v32 = vmov 2102212464   ;;  %s618_s15 = sshll.u32 %s839_s14, 4  ;;  %s619_s15 = int_to_ptr.vmem [resolvable:$true] %s618_s15 }
  0x1f   :  { %58 = vperm.xlu0 %711, %v54_v1   ;;  %671 = vmatprep.subr.bf16.mxu0 %v712_v2  ;;  %v715_v5 = vld [vmem:[#allocation2 + $0x30] sm:$0xff]   ;;  %v717_v7 = vld [vmem:[#allocation2 + $0x28] sm:$0xff]   ;;  %v718_v8 = vld [vmem:[#allocation2 + $0x60] sm:$0xff]   ;;  %v834_v34 = vmov 920167782   ;;  %s800_s16 = scalar_lea.vmem %s619_s15, 256  ;;  %p805_p11 = scmp.lt.s32.totalorder %s619_s15, %s619_s15 }
  0x20   :  { %672 = vmatpush3.bf16.msra.mxu0 %v713_v3  ;;  %v719_v9 = vld [vmem:[#allocation2 + $0x20] sm:$0xff]   ;;  %v720_v10 = vld [vmem:[#allocation2 + $0x58] sm:$0xff]   ;;  %v722_v12 = vld [vmem:[#allocation2 + $0x50] sm:$0xff]   ;;  %v835_v38 = vmov 1326507024   ;;  %p801_p10 = scmp.ne.s32.totalorder %s619_s15, %s800_s16  ;;  %p806_p12 = scmp.lt.s32.totalorder %s800_s16, %s800_s16 }
  0x21   :  { %673 = vmatprep.subr.bf16.mxu0 %v714_v4  ;;  %v721_v11 = vld [vmem:[#allocation2 + $0x18] sm:$0xff]   ;;  %v723_v13 = vld [vmem:[#allocation2 + $0x10] sm:$0xff]   ;;  %v724_v14 = vld [vmem:[#allocation2 + $0x48] sm:$0xff]   ;;  %v836_v40 = vmov 683565275  }
  0x22   :  { %v725_v15 = vld [vmem:[#allocation2 + $0x8] sm:$0xff]   ;;  %v726_v16 = vld [vmem:[#allocation2 + $0x40] sm:$0xff]   ;;  %v837_v42 = vmov 2475754826   ;;  %v838_v45 = vmov 2131351028   ;;  %p807_p13 = por %p806_p12, %p805_p11 }
  0x23   :  { %v727_v17 = vld [vmem:[#allocation2] sm:$0xff]  }
  0x24   :  { %674 = vmatpush3.bf16.msra.mxu0 %v715_v5  ;;  %v628_v18 = vld [vmem:[%s918_s1] ss:$0 sm:$0xff]  ;;  %p808_p0 = pnand %p807_p13, %p801_p10 }
  0x25   :  { %675 = vmatprep.subr.bf16.mxu0 %v716_v6 }
  0x28   :  { %676 = vmatpush3.bf16.msra.mxu0 %v717_v7 }
  0x29   :  { %677 = vmatprep.subr.bf16.mxu0 %v718_v8 }
  0x2c   :  { %678 = vmatpush3.bf16.msra.mxu0 %v719_v9 }
  0x2d   :  { %679 = vmatprep.subr.bf16.mxu0 %v720_v10 }
  0x30   :  { %680 = vmatpush3.bf16.msra.mxu0 %v721_v11 }
  0x31   :  { %681 = vmatprep.subr.bf16.mxu0 %v722_v12 }
  0x34   :  { %682 = vmatpush3.bf16.msra.mxu0 %v723_v13 }
  0x35   :  { %683 = vmatprep.subr.bf16.mxu0 %v724_v14 }
  0x38   :  { %684 = vmatpush3.bf16.msra.mxu0 %v725_v15 }
  0x39   :  { %685 = vmatprep.subr.bf16.mxu0 %v726_v16 }
  0x3c   :  { %686 = vmatpush3.bf16.msra.mxu0 %v727_v17 }
  0x9a   :  { %v59_v19 = vpop.permute.xlu0 %58 }
  0x9b   :  { %v887_v20 = vmul.f32 %v628_v18, %v59_v19 }
  0x9d   :  { %v71_v21 = vand.u32 2139095040, %v887_v20  ;;  %v68_v22 = vand.u32 2147483647, %v887_v20  ;;  %vm70_vm7 = vcmp.lt.s32.totalorder %v887_v20, 0  ;;  %vm160_vm15 = vweird.f32 %v887_v20 }
  0x9f   :  { %v72_v23 = vshrl.u32 %v71_v21, 23  ;;  %v75_v25 = vand.u32 8388607, %v68_v22  ;;  %vm69_vm8 = vcmp.le.f32.partialorder %v68_v22, 0.7853982 }
  0xa1   :  { %v629_v24 = vadd.s32 4294967169, %v72_v23  ;;  %v76_v28 = vor.u32 8388608, %v75_v25 }
  0xa3   :  { %v78_v26 = vadd.s32 1, %v629_v24  ;;  %v116_v36 = vshll.u32 %v76_v28, 8 }
  0xa5   :  { %vm79_vm0 = vcmp.gt.s32.totalorder %v78_v26, 0 }
  0xa6   :  { %v80_v27 = vsel %vm79_vm0, %v78_v26, 0 }
  0xa7   :  { %v82_v29 = vand.u32 31, %v80_v27  ;;  %v81_v30 = vshrl.u32 %v80_v27, 5 }
  0xa9   :  { %v83_v31 = vsub.s32 32, %v82_v29  ;;  %v94_v33 = vshll.u32 %v833_v32, %v82_v29  ;;  %v97_v35 = vshll.u32 %v834_v34, %v82_v29  ;;  %v85_v41 = vshll.u32 %v836_v40, %v82_v29 }
  0xaa   :  { %v88_v44 = vshll.u32 %v837_v42, %v82_v29  ;;  %v91_v47 = vshll.u32 %v838_v45, %v82_v29  ;;  %vm103_vm1 = vcmp.lt.s32.totalorder %v81_v30, 4  ;;  %vm100_vm2 = vcmp.lt.s32.totalorder %v81_v30, 1 }
  0xab   :  { %v95_v37 = vshrl.u32 %v834_v34, %v83_v31  ;;  %v98_v39 = vshrl.u32 %v835_v38, %v83_v31  ;;  %v86_v43 = vshrl.u32 %v837_v42, %v83_v31  ;;  %v89_v46 = vshrl.u32 %v838_v45, %v83_v31 }
  0xac   :  { %v92_v48 = vshrl.u32 %v833_v32, %v83_v31  ;;  %v84_v52 = vshrl.u32 %v836_v40, %v83_v31  ;;  %vm101_vm3 = vcmp.lt.s32.totalorder %v81_v30, 2  ;;  %vm102_vm4 = vcmp.lt.s32.totalorder %v81_v30, 3 }
  0xad   :  { %v96_v49 = vor.u32 %v95_v37, %v94_v33  ;;  %v99_v50 = vor.u32 %v98_v39, %v97_v35  ;;  %v87_v51 = vor.u32 %v86_v43, %v85_v41  ;;  %v90_v53 = vor.u32 %v89_v46, %v88_v44 }
  0xae   :  { %v93_v54 = vor.u32 %v92_v48, %v91_v47 }
  0xaf   :  { %v109_v55 = vsel %vm103_vm1, %v96_v49, 920167782  ;;  %v113_v56 = vsel %vm103_vm1, %v99_v50, 1326507024  ;;  %v108_v58 = vsel %vm100_vm2, %v87_v51, %v90_v53  ;;  %v104_v61 = vsel %vm100_vm2, %v84_v52, %v87_v51 }
  0xb0   :  { %v105_v57 = vsel %vm103_vm1, %v93_v54, 2102212464  ;;  %v110_v59 = vsel %vm102_vm4, %v93_v54, %v109_v55  ;;  %v112_v60 = vsel %vm100_vm2, %v90_v53, %v93_v54  ;;  %v114_v0 = vsel %vm102_vm4, %v96_v49, %v113_v56  ;;  %v728_v56 = vld [vmem:[#allocation5 + $0x74] ss:$8 sps:$4 sm:$0xff]  }
  0xb1   :  { %v106_v62 = vsel %vm102_vm4, %v90_v53, %v105_v57  ;;  %v111_v63 = vsel %vm101_vm3, %v108_v58, %v110_v59  ;;  %v115_v1 = vsel %vm101_vm3, %v112_v60, %v114_v0  ;;  %v730_v57 = vld [vmem:[#allocation5 + $0x70] ss:$8 sps:$4 sm:$0xff]   ;;  %569 = vmatprep.subr.bf16.mxu1 %v728_v56  ;;  %v731_v58 = vld [vmem:[#allocation5 + $0x64] ss:$8 sps:$4 sm:$0xff]   ;;  %v733_v59 = vld [vmem:[#allocation5 + $0x60] ss:$8 sps:$4 sm:$0xff]  }
  0xb2   :  { %v893_v2 = vmul.u32.u64.low %v116_v36, %v111_v63  ;;  %v894_v3 = vmul.u32.u64.high %v116_v36, %v111_v63, %v893_v2  ;;  %v896_v4 = vmul.u32.u64.low %v116_v36, %v115_v1  ;;  %v897_v5 = vmul.u32.u64.high %v116_v36, %v115_v1, %v896_v4  ;;  %570 = vmatpush1.bf16.msra.mxu1 %v730_v57  ;;  %v734_v60 = vld [vmem:[#allocation5 + $0x54] ss:$8 sps:$4 sm:$0xff]   ;;  %v742_v0 = vld [vmem:[#allocation5 + $0x30] ss:$8 sps:$4 sm:$0xff]   ;;  %v743_v1 = vld [vmem:[#allocation5 + $0x24] ss:$8 sps:$4 sm:$0xff]  }
  0xb3   :  { %v107_v6 = vsel %vm101_vm3, %v104_v61, %v106_v62  ;;  %571 = vmatprep.subr.bf16.mxu1 %v731_v58  ;;  %v736_v61 = vld [vmem:[#allocation5 + $0x50] ss:$8 sps:$4 sm:$0xff]   ;;  %v739_v62 = vld [vmem:[#allocation5 + $0x40] ss:$8 sps:$4 sm:$0xff]   ;;  %v740_v63 = vld [vmem:[#allocation5 + $0x34] ss:$8 sps:$4 sm:$0xff]  }
  0xb4   :  { %v126_v7 = vadd.s32 1, %v894_v3  ;;  %v123_v8 = vmul.u32 %v116_v36, %v107_v6  ;;  %vm125_vm5 = vc.u32 %v897_v5, %v893_v2  ;;  %v124_v21 = vadd.s32 %v893_v2, %v897_v5  ;;  %v745_v2 = vld [vmem:[#allocation5 + $0x20] ss:$8 sps:$4 sm:$0xff]   ;;  %v748_v4 = vld [vmem:[#allocation5 + $0x10] ss:$8 sps:$4 sm:$0xff]  }
  0xb5   :  { %v749_v5 = vld [vmem:[#allocation5 + $0x4] ss:$8 sps:$4 sm:$0xff]   ;;  %v751_v6 = vld [vmem:[#allocation5] ss:$8 sps:$4 sm:$0xff]  }
  0xb6   :  { %v127_v9 = vsel %vm125_vm5, %v126_v7, %v894_v3  ;;  %572 = vmatpush1.bf16.msra.mxu1 %v733_v59  ;;  %v746_v3 = vld [vmem:[#allocation5 + $0x14] ss:$8 sps:$4 sm:$0xff]  }
  0xb7   :  { %v128_v10 = vadd.s32 %v127_v9, %v123_v8  ;;  %573 = vmatprep.subr.bf16.mxu1 %v734_v60  ;;  %v637_v8 = vld [vmem:[%s920_s3] ss:$0 sm:$0xff] }
  0xb9   :  { %v129_v11 = vadd.s32 536870912, %v128_v10 }
  0xba   :  { %574 = vmatpush1.bf16.msra.mxu1 %v736_v61 }
  0xbb   :  { %v130_v12 = vshrl.u32 %v129_v11, 30 }
  0xbd   :  { %v131_v13 = vshll.u32 %v130_v12, 30  ;;  %v154_v35 = vsub.s32 4, %v130_v12 }
  0xbf   :  { %v132_v14 = vsub.s32 %v128_v10, %v131_v13  ;;  %v155_v38 = vsel %vm70_vm7, %v154_v35, %v130_v12 }
  0xc0   :  { %v157_v39 = vsel %vm69_vm8, 0, %v155_v38 }
  0xc1   :  { %v134_v15 = vsub.s32 0, %v132_v14  ;;  %v264_v40 = vadd.s32 3, %v157_v39  ;;  %v161_v41 = vand.u32 3, %v157_v39 }
  0xc3   :  { %v630_v16 = vmin.u32 %v134_v15, %v132_v14  ;;  %v265_v42 = vand.u32 3, %v264_v40  ;;  %vm166_vm9 = vcmp.eq.s32.totalorder %v161_v41, 2  ;;  %vm163_vm11 = vcmp.eq.s32.totalorder %v161_v41, 0 }
  0xc4   :  { %vm162_vm13 = vcmp.lt.s32.totalorder %v161_v41, 2 }
  0xc5   :  { %v136_v17 = vclz %v630_v16  ;;  %vm270_vm10 = vcmp.eq.s32.totalorder %v265_v42, 2  ;;  %vm267_vm12 = vcmp.eq.s32.totalorder %v265_v42, 0  ;;  %vm266_vm14 = vcmp.lt.s32.totalorder %v265_v42, 2 }
  0xc7   :  { %v631_v18 = vadd.s32 4294967294, %v136_v17 }
  0xc9   :  { %vm632_vm6 = vcmp.lt.s32.totalorder %v631_v18, 0 }
  0xca   :  { %v139_v19 = vsel %vm632_vm6, 0, %v631_v18 }
  0xcb   :  { %v140_v23 = vsub.s32 32, %v139_v19  ;;  %v144_v24 = vsub.s32 4294967266, %v139_v19  ;;  %v141_v25 = vshll.u32 %v132_v14, %v139_v19 }
  0xcd   :  { %v142_v26 = vshrl.u32 %v124_v21, %v140_v23  ;;  %v145_v27 = vadd.s32 127, %v144_v24  ;;  %v479_v23 = vlaneseq }
  0xcf   :  { %v143_v28 = vor.u32 %v142_v26, %v141_v25  ;;  %v146_v29 = vshll.u32 %v145_v27, 23  ;;  %v480_v24 = vshrl.u32 %v479_v23, 7  ;;  %v477_v26 = vld [vmem:[%s922_s5] sm:$0x3] }
  0xd1   :  { %v147_v30 = vor.u32 4788187, %v146_v29  ;;  %v150_v32 = vcvt.s32.f32 %v143_v28  ;;  %v481_v25 = vsub.s32 0, %v480_v24  ;;  %v485_v27 = vsub.s32 1, %v480_v24 }
  0xd3   :  { %v148_v31 = vand.u32 2147483647, %v147_v30  ;;  %v482_v28 = vrot.slane %v477_v26, %v481_v25  ;;  %v486_v29 = vrot.slane %v477_v26, %v485_v27 }
  0xd5   :  { %v151_v33 = vmul.f32 %v150_v32, %v148_v31 }
  0xd7   :  { %v152_v34 = vxor.u32 2147483648, %v151_v33 }
  0xd9   :  { %v153_v36 = vsel %vm70_vm7, %v152_v34, %v151_v33 }
  0xda   :  { %v156_v37 = vsel %vm69_vm8, %v887_v20, %v153_v36  ;;  %v737_v20 = vld [vmem:[#allocation5 + $0x44] ss:$8 sps:$4 sm:$0xff]  }
  0xdb   :  { %752 = vcosq.f32 %v156_v37  ;;  %575 = vmatprep.subr.bf16.mxu1 %v737_v20 }
  0xdc   :  { %754 = vsinq.f32 %v156_v37  ;;  %576 = vmatpush1.bf16.msra.mxu1 %v739_v62 }
  0xdd   :  { %577 = vmatprep.subr.bf16.mxu1 %v740_v63 }
  0xe0   :  { %578 = vmatpush1.bf16.msra.mxu1 %v742_v0 }
  0xe1   :  { %579 = vmatprep.subr.bf16.mxu1 %v743_v1 }
  0xe4   :  { %580 = vmatpush1.bf16.msra.mxu1 %v745_v2 }
  0xe5   :  { %581 = vmatprep.subr.bf16.mxu1 %v746_v3 }
  0xe8   :  { %v753_v43 = vpop.eup %752  ;;  %582 = vmatpush1.bf16.msra.mxu1 %v748_v4 }
  0xe9   :  { %v755_v44 = vpop.eup %754  ;;  %v167_v45 = vxor.u32 2147483648, %v753_v43  ;;  %583 = vmatprep.subr.bf16.mxu1 %v749_v5 }
  0xea   :  { %v164_v46 = vxor.u32 2147483648, %v755_v44 }
  0xeb   :  { %v168_v47 = vsel %vm166_vm9, %v167_v45, %v755_v44  ;;  %v272_v22 = vsel %vm270_vm10, %v167_v45, %v755_v44 }
  0xec   :  { %v165_v48 = vsel %vm163_vm11, %v753_v43, %v164_v46  ;;  %v269_v49 = vsel %vm267_vm12, %v753_v43, %v164_v46  ;;  %584 = vmatpush1.bf16.msra.mxu1 %v751_v6 }
  0xed   :  { %v169_v50 = vsel %vm162_vm13, %v165_v48, %v168_v47  ;;  %v273_v51 = vsel %vm266_vm14, %v269_v49, %v272_v22 }
  0xee   :  { %v170_v52 = vsel %vm160_vm15, nan, %v169_v50  ;;  %v274_v53 = vsel %vm160_vm15, nan, %v273_v51 }
  0xef   :  { %v275_v54 = vpack.c.bf16 %v170_v52, %v170_v52  ;;  %v276_v55 = vpack.c.bf16 %v274_v53, %v274_v53 }
  0xf1   :  { %444 = vmatprep.mubr.bf16.mxu0 %v276_v55 }
  0xf2   :  { %445 = vmatmul.mubr.bf16.vlgmr.msra.gmra.mxu0 %v275_v54 }
 0x1b2   :  { %v687_v7 = vpop.f32.mrf.mxu0 }
 0x1b4   :  { %v688_v9 = vpop.f32.mrf.mxu0 }
 0x1b5   :  { %v689_v10 = vadd.f32 %v688_v9, %v687_v7 }
 0x1b6   :  { %v690_v11 = vpop.f32.mrf.mxu0 }
 0x1b7   :  { %v447_v12 = vadd.f32 %v689_v10, %v637_v8 }
 0x1b8   :  { %v691_v13 = vpop.f32.mrf.mxu0 }
 0x1b9   :  { %v452_v14 = vpack.c.bf16 %v447_v12, %v447_v12 }
 0x1bb   :  { %v654_v15 = vmul.bf16 3216621497, %v452_v14 }
 0x1bd   :  { %756 = vpow.bf16 %v654_v15 }
 0x1cb   :  { %v757_v16 = vpop.eup %756 }
 0x1cc   :  { %v457_v17 = vadd.bf16 1065369472, %v757_v16 }
 0x1ce   :  { %758 = vrcp.bf16 %v457_v17 }
 0x1dc   :  { %v759_v18 = vpop.eup %758 }
 0x1dd   :  { %v459_v19 = vmul.bf16 1065369472, %v759_v18 }
 0x1df   :  { %v460_v21 = vmul.bf16 %v459_v19, %v452_v14 }
 0x1e1   :  { %602 = vmatmul.mubr.bf16.vlgmr.msra.gmra.mxu1 %v460_v21 }
 0x2a1   :  { %v603_v30 = vpop.f32.mrf.mxu1 }
 0x2a2   :  { %v604_v31 = vadd.f32 %v603_v30, %v482_v28 }
 0x2a3   :  { %v605_v32 = vpop.f32.mrf.mxu1 }
 0x2a4   :  { %610 = vst [vmem:[#allocation7] sm:$0xff] %v604_v31  ;;  %v606_v33 = vadd.f32 %v605_v32, %v486_v29 }
 0x2a5   :  { %v607_v34 = vpop.f32.mrf.mxu1 }
 0x2a6   :  { %611 = vst [vmem:[#allocation7 + $0x8] sm:$0xff] %v606_v33 }
 0x2a7   :  { %v608_v35 = vpop.f32.mrf.mxu1 }
 0x2a8   :  { %811 = shalt.err (!%p808_p0)
}
 0x2a9   :  { %621 = dma.vmem_to_hbm [thread:$0]  %s619_s15, 256, %s923_s6, [#allocation4]  }
 0x2aa   :  { %824 = dma.done.wait [#allocation4], 256  }
 0x2ab   :  { %825 = vsyncadd [#allocation4], 4294967040 }
 0x2ac   :  { %625 = vsyncpa [#allocation3], 1 }
 0x2ad   :  { %626 = vsyncpa [#allocation6], 1 }
 0x2ae   :  { %627 = vsyncpa [#allocation4], 1 }

</bundles_post_ra>
